<compile_context>
chip_gen: v7x
topology: tpu7x:2x2x1
jax: 0.10.0
libtpu: 0.0.40
codegen_flags: <defaults>
</compile_context>

<pallas_src>
import functools

import jax
import jax.numpy as jnp
from jax import lax
from jax.experimental import pallas as pl
from jax.experimental.pallas import tpu as pltpu

HID = 512        # fc1 output width (fixed by the module)
LANE_PAD = 128   # pad the code / BN feature axis up to a full lane group


# ---------------------------------------------------------------------------
# Kernels
# ---------------------------------------------------------------------------
def _fc2_bn_epilogue(h, w2_ref, b2_ref, z_ref, c_real, inv_b):
    """LeakyReLU(0.2) -> fc2 -> BatchNorm1d(affine=False, eps=0), all in f32."""
    # LeakyReLU(0.2): max(h, 0.2*h) is exact for both signs.
    h = jnp.maximum(h, 0.2 * h)

    # fc2 on the 128-lane padded code axis (padded weight columns are zero).
    z = jnp.dot(h.astype(w2_ref.dtype), w2_ref[...],
                preferred_element_type=jnp.float32) + b2_ref[...]

    # BatchNorm1d training mode: biased batch stats, eps = 0.
    mean = jnp.sum(z, axis=0, keepdims=True) * inv_b
    diff = z - mean
    var = jnp.sum(diff * diff, axis=0, keepdims=True) * inv_b

    # Padded lanes have var == 0 -> guard them so rsqrt stays finite.
    # Real lanes keep exact eps=0 semantics (a degenerate real lane would
    # produce inf/NaN, matching torch eps=0 behavior).
    lane = lax.broadcasted_iota(jnp.int32, var.shape, 1)
    safe_var = jnp.where(lane < c_real, var, 1.0)
    z_ref[...] = diff * lax.rsqrt(safe_var)


def _encoder_kernel_single(x_ref, w1_ref, b1_ref, w2_ref, b2_ref, z_ref, *,
                           c_real: int, inv_b: float):
    """Single grid step: whole fc1 contraction in one MXU pass (v6e/v7x)."""
    h = jnp.dot(x_ref[...].astype(w1_ref.dtype), w1_ref[...],
                preferred_element_type=jnp.float32) + b1_ref[...]
    _fc2_bn_epilogue(h, w2_ref, b2_ref, z_ref, c_real, inv_b)


def _encoder_kernel_ktiled(x_ref, w1_ref, b1_ref, w2_ref, b2_ref, z_ref,
                           h_acc, *, c_real: int, inv_b: float):
    """Grid axis 0 tiles the fc1 contraction (used on v5e: 2 K-steps)."""
    k = pl.program_id(0)

    @pl.when(k == 0)
    def _():
        h_acc[...] = jnp.zeros_like(h_acc)

    h_acc[...] += jnp.dot(x_ref[...].astype(w1_ref.dtype), w1_ref[...],
                          preferred_element_type=jnp.float32)

    @pl.when(k == pl.num_programs(0) - 1)
    def _():
        _fc2_bn_epilogue(h_acc[...] + b1_ref[...], w2_ref, b2_ref, z_ref,
                         c_real, inv_b)


# ---------------------------------------------------------------------------
# Parameter preparation (ONE-TIME, not part of the forward path)
# ---------------------------------------------------------------------------
def prepare_encoder_params(w1, b1, w2, b2):
    """Cast weights to bf16 and zero-pad the code axis once at init time."""
    D, hid = w1.shape
    assert hid == HID
    C = w2.shape[1]
    CP = ((C + LANE_PAD - 1) // LANE_PAD) * LANE_PAD
    w1_bf = w1.astype(jnp.bfloat16)
    w2_pad = jnp.zeros((HID, CP), jnp.bfloat16).at[:, :C].set(
        w2.astype(jnp.bfloat16))
    b1_2d = b1.reshape(1, HID).astype(jnp.float32)
    b2_pad = jnp.zeros((1, CP), jnp.float32).at[0, :C].set(
        b2.astype(jnp.float32))
    return w1_bf, b1_2d, w2_pad, b2_pad, C


def _pick_k_tile(D: int) -> int:
    """Single step on v6e/v7x; two K-steps on v5e (slower HBM, keep overlap)."""
    try:
        kind = jax.devices()[0].device_kind.lower()
    except Exception:  # pragma: no cover - defensive
        kind = ""
    is_v5e = ("v5e" in kind) or ("v5 lite" in kind) or ("v5lite" in kind)
    if is_v5e and D > 512 and D % 512 == 0:
        return 512
    return D


# ---------------------------------------------------------------------------
# Forward
# ---------------------------------------------------------------------------
def encoder_forward(x_nchw, w1_bf, b1_2d, w2_pad, b2_pad, *, code: int):
    B = x_nchw.shape[0]
    D = w1_bf.shape[0]
    CP = w2_pad.shape[1]

    # Same as torch .view(B, -1) (row-major flatten of NCHW). x stays f32 and
    # is cast to bf16 inside the kernel, after the DMA.
    x_flat = x_nchw.reshape(B, D)

    tk = _pick_k_tile(D)
    num_k = D // tk
    inv_b = 1.0 / B

    cost = pl.CostEstimate(
        flops=2 * B * D * HID + 2 * B * HID * CP,
        transcendentals=0,
        bytes_accessed=(x_flat.size * x_flat.dtype.itemsize
                        + w1_bf.size * 2 + w2_pad.size * 2
                        + b1_2d.size * 4 + b2_pad.size * 4
                        + B * CP * 4),
    )

    in_specs = [
        pl.BlockSpec((B, tk), lambda k: (0, k)),     # x K-slice (f32)
        pl.BlockSpec((tk, HID), lambda k: (k, 0)),   # w1 K-slice (bf16)
        pl.BlockSpec((1, HID), lambda k: (0, 0)),    # b1
        pl.BlockSpec((HID, CP), lambda k: (0, 0)),   # w2 (lane-padded, bf16)
        pl.BlockSpec((1, CP), lambda k: (0, 0)),     # b2 (lane-padded)
    ]
    out_spec = pl.BlockSpec((B, CP), lambda k: (0, 0))

    if num_k == 1:
        kernel = functools.partial(_encoder_kernel_single,
                                   c_real=code, inv_b=inv_b)
        scratch = []
    else:
        kernel = functools.partial(_encoder_kernel_ktiled,
                                   c_real=code, inv_b=inv_b)
        scratch = [pltpu.VMEM((B, HID), jnp.float32)]

    z_pad = pl.pallas_call(
        kernel,
        out_shape=jax.ShapeDtypeStruct((B, CP), jnp.float32),
        grid_spec=pltpu.PrefetchScalarGridSpec(
            num_scalar_prefetch=0,
            grid=(num_k,),
            in_specs=in_specs,
            out_specs=out_spec,
            scratch_shapes=scratch,
        ),
        compiler_params=pltpu.CompilerParams(
            dimension_semantics=("arbitrary",),
        ),
        cost_estimate=cost,
    )(x_flat, w1_bf, b1_2d, w2_pad, b2_pad)

    # Drop the zero-padded lanes.
    return z_pad[:, :code]


# ---------------------------------------------------------------------------
# Self-test
# ---------------------------------------------------------------------------
if __name__ == "__main__":
    # Small shapes consistent with the module: input_shape=(4, 16, 16), code=4.
    # B >= 2 is required by BatchNorm1d in training mode.
    B, Cin, Hh, Ww = 8, 4, 16, 16
    D = Cin * Hh * Ww          # 1024 (fc1 input size)
    CODE = 4                   # code_size / latent_dim

    key = jax.random.PRNGKey(0)
    kx, kw1, kb1, kw2, kb2 = jax.random.split(key, 5)

    x = jax.random.normal(kx, (B, Cin, Hh, Ww), dtype=jnp.float32)

    # Deterministic parameter init (uniform, like nn.Linear default ranges).
    bound1 = 1.0 / jnp.sqrt(D)
    w1 = jax.random.uniform(kw1, (D, HID), jnp.float32, -bound1, bound1)
    b1 = jax.random.uniform(kb1, (HID,), jnp.float32, -bound1, bound1)
    bound2 = 1.0 / jnp.sqrt(HID)
    w2 = jax.random.uniform(kw2, (HID, CODE), jnp.float32, -bound2, bound2)
    b2 = jax.random.uniform(kb2, (CODE,), jnp.float32, -bound2, bound2)

    # One-time parameter preparation (hoisted out of the forward path).
    w1_bf, b1_2d, w2_pad, b2_pad, code = prepare_encoder_params(w1, b1, w2, b2)

    fwd = jax.jit(functools.partial(encoder_forward, code=code))
    z = fwd(x, w1_bf, b1_2d, w2_pad, b2_pad)
    z = jax.block_until_ready(z)

    # Pure-JAX reference with the same bf16 weight/activation quantization and
    # f32 accumulation (matches the kernel's numerics).
    xf = x.reshape(B, -1).astype(jnp.bfloat16)
    h_ref = jnp.dot(xf, w1.astype(jnp.bfloat16),
                    preferred_element_type=jnp.float32) + b1
    h_ref = jnp.where(h_ref > 0, h_ref, 0.2 * h_ref)
    z_ref = jnp.dot(h_ref.astype(jnp.bfloat16), w2.astype(jnp.bfloat16),
                    preferred_element_type=jnp.float32) + b2
    mu = jnp.mean(z_ref, axis=0, keepdims=True)
    var = jnp.mean((z_ref - mu) ** 2, axis=0, keepdims=True)
    z_ref = (z_ref - mu) / jnp.sqrt(var)   # eps = 0 exactly

    assert z.shape == (B, CODE)
    assert jnp.allclose(z, z_ref, atol=1e-2, rtol=1e-2), float(
        jnp.max(jnp.abs(z - z_ref)))
    print("KERNEL_OK")
</pallas_src>

<mosaic_0001>
module attributes {stable_mosaic.version = 11 : i64} {
  func.func @_encoder_kernel_single(%arg0: i32, %arg1: memref<8x1024xf32, #tpu.memory_space<vmem>>, %arg2: memref<1024x512xbf16, #tpu.memory_space<vmem>>, %arg3: memref<1x512xf32, #tpu.memory_space<vmem>>, %arg4: memref<512x128xbf16, #tpu.memory_space<vmem>>, %arg5: memref<1x128xf32, #tpu.memory_space<vmem>>, %arg6: memref<8x128xf32, #tpu.memory_space<vmem>>) attributes {dimension_semantics = [#tpu.dimension_semantics<arbitrary>], iteration_bounds = array<i64: 1>, scalar_prefetch = 0 : i64, scratch_operands = 0 : i64, tpu.core_type = #tpu.core_type<tc>, window_params = [{transform_indices = @transform_0, window_bounds = array<i64: 8, 1024>}, {transform_indices = @transform_1, window_bounds = array<i64: 1024, 512>}, {pipeline_mode = #tpu.pipeline_mode<synchronous>, transform_indices = @transform_2, window_bounds = array<i64: 1, 512>}, {pipeline_mode = #tpu.pipeline_mode<synchronous>, transform_indices = @transform_3, window_bounds = array<i64: 512, 128>}, {pipeline_mode = #tpu.pipeline_mode<synchronous>, transform_indices = @transform_4, window_bounds = array<i64: 1, 128>}, {pipeline_mode = #tpu.pipeline_mode<synchronous>, transform_indices = @transform_5, window_bounds = array<i64: 8, 128>}]} {
    %c0 = arith.constant 0 : index
    %c0_0 = arith.constant 0 : index
    %0 = vector.load %arg1[%c0, %c0_0] : memref<8x1024xf32, #tpu.memory_space<vmem>>, vector<8x1024xf32>
    %1 = arith.truncf %0 : vector<8x1024xf32> to vector<8x1024xbf16>
    %c0_1 = arith.constant 0 : index
    %c0_2 = arith.constant 0 : index
    %2 = vector.load %arg2[%c0_1, %c0_2] : memref<1024x512xbf16, #tpu.memory_space<vmem>>, vector<1024x512xbf16>
    %cst = arith.constant dense<0.000000e+00> : vector<8x512xf32>
    %3 = tpu.matmul %1, %2, %cst {dimension_numbers = #tpu.dot_dimension_numbers<[1], [0], [0], [1], [0, 0, 1, 1], [], []>} : vector<8x1024xbf16>, vector<1024x512xbf16>, vector<8x512xf32> -> vector<8x512xf32>
    %c0_3 = arith.constant 0 : index
    %c0_4 = arith.constant 0 : index
    %4 = vector.load %arg3[%c0_3, %c0_4] : memref<1x512xf32, #tpu.memory_space<vmem>>, vector<1x512xf32>
    %5 = vector.broadcast %4 : vector<1x512xf32> to vector<8x512xf32>
    %6 = arith.addf %3, %5 : vector<8x512xf32>
    %cst_5 = arith.constant 2.000000e-01 : f32
    %7 = vector.broadcast %cst_5 : f32 to vector<8x512xf32>
    %8 = arith.mulf %7, %6 : vector<8x512xf32>
    %9 = arith.maximumf %6, %8 : vector<8x512xf32>
    %10 = arith.truncf %9 : vector<8x512xf32> to vector<8x512xbf16>
    %c0_6 = arith.constant 0 : index
    %c0_7 = arith.constant 0 : index
    %11 = vector.load %arg4[%c0_6, %c0_7] : memref<512x128xbf16, #tpu.memory_space<vmem>>, vector<512x128xbf16>
    %cst_8 = arith.constant dense<0.000000e+00> : vector<8x128xf32>
    %12 = tpu.matmul %10, %11, %cst_8 {dimension_numbers = #tpu.dot_dimension_numbers<[1], [0], [0], [1], [0, 0, 1, 1], [], []>} : vector<8x512xbf16>, vector<512x128xbf16>, vector<8x128xf32> -> vector<8x128xf32>
    %c0_9 = arith.constant 0 : index
    %c0_10 = arith.constant 0 : index
    %13 = vector.load %arg5[%c0_9, %c0_10] : memref<1x128xf32, #tpu.memory_space<vmem>>, vector<1x128xf32>
    %14 = vector.broadcast %13 : vector<1x128xf32> to vector<8x128xf32>
    %15 = arith.addf %12, %14 : vector<8x128xf32>
    %cst_11 = arith.constant dense<0.000000e+00> : vector<128xf32>
    %16 = vector.multi_reduction <add>, %15, %cst_11 [0] : vector<8x128xf32> to vector<128xf32>
    %17 = vector.shape_cast %16 : vector<128xf32> to vector<1x128xf32>
    %cst_12 = arith.constant 1.250000e-01 : f32
    %18 = vector.broadcast %cst_12 : f32 to vector<1x128xf32>
    %19 = arith.mulf %17, %18 : vector<1x128xf32>
    %20 = vector.broadcast %19 : vector<1x128xf32> to vector<8x128xf32>
    %21 = arith.subf %15, %20 : vector<8x128xf32>
    %22 = arith.mulf %21, %21 : vector<8x128xf32>
    %cst_13 = arith.constant dense<0.000000e+00> : vector<128xf32>
    %23 = vector.multi_reduction <add>, %22, %cst_13 [0] : vector<8x128xf32> to vector<128xf32>
    %24 = vector.shape_cast %23 : vector<128xf32> to vector<1x128xf32>
    %cst_14 = arith.constant 1.250000e-01 : f32
    %25 = vector.broadcast %cst_14 : f32 to vector<1x128xf32>
    %26 = arith.mulf %24, %25 : vector<1x128xf32>
    %27 = tpu.iota {dimensions = array<i32: 1>} : vector<1x128xi32>
    %c4_i32 = arith.constant 4 : i32
    %28 = vector.broadcast %c4_i32 : i32 to vector<1x128xi32>
    %29 = arith.cmpi slt, %27, %28 : vector<1x128xi32>
    %cst_15 = arith.constant 1.000000e+00 : f32
    %30 = vector.broadcast %cst_15 : f32 to vector<1x128xf32>
    %31 = arith.select %29, %26, %30 : vector<1x128xi1>, vector<1x128xf32>
    %32 = math.rsqrt %31 : vector<1x128xf32>
    %33 = vector.broadcast %32 : vector<1x128xf32> to vector<8x128xf32>
    %34 = arith.mulf %21, %33 : vector<8x128xf32>
    %c0_16 = arith.constant 0 : index
    %c0_17 = arith.constant 0 : index
    %35 = vector.load %arg6[%c0_16, %c0_17] : memref<8x128xf32, #tpu.memory_space<vmem>>, vector<8x128xf32>
    tpu.vector_store %arg6[%c0_16, %c0_17], %34 {strides = array<i32>} : memref<8x128xf32, #tpu.memory_space<vmem>>, vector<8x128xf32>,
    return
  }
  func.func @transform_0(%arg0: i32) -> (i32, i32) {
    %c0_i32 = arith.constant 0 : i32
    %c0_i32_0 = arith.constant 0 : i32
    return %c0_i32, %arg0 : i32, i32
  }
  func.func @transform_1(%arg0: i32) -> (i32, i32) {
    %c0_i32 = arith.constant 0 : i32
    %c0_i32_0 = arith.constant 0 : i32
    return %arg0, %c0_i32 : i32, i32
  }
  func.func @transform_2(%arg0: i32) -> (i32, i32) {
    %c0_i32 = arith.constant 0 : i32
    %c0_i32_0 = arith.constant 0 : i32
    %c0_i32_1 = arith.constant 0 : i32
    return %c0_i32, %c0_i32_0 : i32, i32
  }
  func.func @transform_3(%arg0: i32) -> (i32, i32) {
    %c0_i32 = arith.constant 0 : i32
    %c0_i32_0 = arith.constant 0 : i32
    %c0_i32_1 = arith.constant 0 : i32
    return %c0_i32, %c0_i32_0 : i32, i32
  }
  func.func @transform_4(%arg0: i32) -> (i32, i32) {
    %c0_i32 = arith.constant 0 : i32
    %c0_i32_0 = arith.constant 0 : i32
    %c0_i32_1 = arith.constant 0 : i32
    return %c0_i32, %c0_i32_0 : i32, i32
  }
  func.func @transform_5(%arg0: i32) -> (i32, i32) {
    %c0_i32 = arith.constant 0 : i32
    %c0_i32_0 = arith.constant 0 : i32
    %c0_i32_1 = arith.constant 0 : i32
    return %c0_i32, %c0_i32_0 : i32, i32
  }
}

</mosaic_0001>

<bundles_post_ra>
// kernel: encoder_forward.1
= control target key start
LH: loop header
LB: loop body
LE: loop exit
PB: predicated region body
PF: predicated region fallthrough
CT: control target
= control target key end

     0   :  { %10 = vsyncpa [#allocation3], 0  ;;  %s3126_s18 = smov [#allocation2]   ;;  %s3302_s0 = inlined_call_operand.vmem [shape: f32[8,1024], index: 0, kind: input, shape index: {}]   ;;  %s3303_s1 = inlined_call_operand.hbm [shape: bf16[1024,512], index: 1, kind: input, shape index: {}]   ;;  %s3304_s2 = inlined_call_operand.vmem [shape: f32[1,512], index: 2, kind: input, shape index: {}]   ;;  %s3305_s3 = inlined_call_operand.vmem [shape: bf16[512,128], index: 3, kind: input, shape index: {}]   ;;  %s3306_s4 = inlined_call_operand.vmem [shape: f32[1,128], index: 4, kind: input, shape index: {}]   ;;  %s3307_s5 = inlined_call_operand.vmem [shape: f32[8,128], index: 5, kind: output, shape index: {}]  }
   0x1   :  { %s18_s19 = sshll.u32 %s3126_s18, 4  ;;  %s3102_s22 = scalar_lea.hbm %s3303_s1, 32768  ;;  %s19_s19 = int_to_ptr.vmem [resolvable:$true] %s18_s19 }
   0x2   :  { %p3103_p0 = scmp.ne.s32.totalorder %s3303_s1, %s3102_s22  ;;  %p3106_p1 = scmp.lt.u32.totalorder %s3102_s22, %s3303_s1 }
   0x4   :  { %p3108_p2 = pnand %p3106_p1, %p3103_p0 }
   0x6   :  { %3111 = shalt.err (!%p3108_p2)
}
   0x7   :  { %s3112_s27 = scalar_lea.vmem %s19_s19, 32768  ;;  %p3117_p4 = scmp.lt.s32.totalorder %s19_s19, %s19_s19 }
   0x8   :  { %p3113_p3 = scmp.ne.s32.totalorder %s19_s19, %s3112_s27  ;;  %p3118_p5 = scmp.lt.s32.totalorder %s3112_s27, %s3112_s27 }
   0xa   :  { %p3119_p6 = por %p3118_p5, %p3117_p4 }
   0xc   :  { %p3120_p7 = pnand %p3119_p6, %p3113_p3 }
   0xe   :  { %3123 = shalt.err (!%p3120_p7)
}
   0xf   :  { %s3127_s28 = smov 256   ;;  %s3128_s29 = smov 16  }
  0x10   :  { %24 = dma.hbm_to_vmem [thread:$0]  %s3303_s1, 32768, %s19_s19, [#allocation3], %s3127_s28, %s3127_s28, %s3128_s29  }
  0x11   :  { %3124 = dma.done.wait [#allocation3], 32768  }
  0x12   :  { %3125 = vsyncadd [#allocation3], 4294934528  ;;  %v2684_v0 = vld [vmem:[#allocation2 + $0x4] ss:$16 sps:$4 sm:$0xff]   ;;  %v2686_v1 = vld [vmem:[#allocation2 + $0xc] ss:$16 sps:$4 sm:$0xff]  }
  0x13   :  { %1609 = vmatprep.subr.bf16.mxu0 %v2684_v0  ;;  %v2688_v2 = vld [vmem:[#allocation2] ss:$16 sps:$4 sm:$0xff]   ;;  %v2689_v3 = vld [vmem:[#allocation2 + $0x8] ss:$16 sps:$4 sm:$0xff]   ;;  %1773 = vmatprep.subr.bf16.mxu1 %v2686_v1  ;;  %v2690_v4 = vld [vmem:[#allocation2 + $0x24] ss:$16 sps:$4 sm:$0xff]  }
  0x14   :  { %1610 = vmatpush1.bf16.msra.mxu0 %v2688_v2  ;;  %1774 = vmatpush1.bf16.msra.mxu1 %v2689_v3  ;;  %v2692_v5 = vld [vmem:[#allocation2 + $0x2c] ss:$16 sps:$4 sm:$0xff]   ;;  %v2694_v6 = vld [vmem:[#allocation2 + $0x20] ss:$16 sps:$4 sm:$0xff]   ;;  %v2695_v7 = vld [vmem:[#allocation2 + $0x28] ss:$16 sps:$4 sm:$0xff]  }
  0x15   :  { %1611 = vmatprep.subr.bf16.mxu0 %v2690_v4  ;;  %1775 = vmatprep.subr.bf16.mxu1 %v2692_v5  ;;  %v2696_v8 = vld [vmem:[#allocation2 + $0x44] ss:$16 sps:$4 sm:$0xff]   ;;  %v2698_v9 = vld [vmem:[#allocation2 + $0x4c] ss:$16 sps:$4 sm:$0xff]   ;;  %v2700_v10 = vld [vmem:[#allocation2 + $0x40] ss:$16 sps:$4 sm:$0xff]  }
  0x16   :  { %v2701_v11 = vld [vmem:[#allocation2 + $0x48] ss:$16 sps:$4 sm:$0xff]   ;;  %v2702_v12 = vld [vmem:[#allocation2 + $0x64] ss:$16 sps:$4 sm:$0xff]   ;;  %v2704_v13 = vld [vmem:[#allocation2 + $0x6c] ss:$16 sps:$4 sm:$0xff]  }
  0x17   :  { %v2706_v14 = vld [vmem:[#allocation2 + $0x60] ss:$16 sps:$4 sm:$0xff]   ;;  %v2707_v15 = vld [vmem:[#allocation2 + $0x68] ss:$16 sps:$4 sm:$0xff]   ;;  %v2708_v16 = vld [vmem:[#allocation2 + $0x84] ss:$16 sps:$4 sm:$0xff]  }
  0x18   :  { %1612 = vmatpush1.bf16.msra.mxu0 %v2694_v6  ;;  %1776 = vmatpush1.bf16.msra.mxu1 %v2695_v7  ;;  %v2710_v17 = vld [vmem:[#allocation2 + $0x8c] ss:$16 sps:$4 sm:$0xff]   ;;  %v2712_v18 = vld [vmem:[#allocation2 + $0x80] ss:$16 sps:$4 sm:$0xff]   ;;  %v2713_v19 = vld [vmem:[#allocation2 + $0x88] ss:$16 sps:$4 sm:$0xff]  }
  0x19   :  { %1613 = vmatprep.subr.bf16.mxu0 %v2696_v8  ;;  %1777 = vmatprep.subr.bf16.mxu1 %v2698_v9  ;;  %v2714_v20 = vld [vmem:[#allocation2 + $0xa4] ss:$16 sps:$4 sm:$0xff]   ;;  %v2716_v21 = vld [vmem:[#allocation2 + $0xac] ss:$16 sps:$4 sm:$0xff]   ;;  %v2718_v22 = vld [vmem:[#allocation2 + $0xa0] ss:$16 sps:$4 sm:$0xff]  }
  0x1a   :  { %v2719_v23 = vld [vmem:[#allocation2 + $0xa8] ss:$16 sps:$4 sm:$0xff]   ;;  %v2720_v24 = vld [vmem:[#allocation2 + $0xc4] ss:$16 sps:$4 sm:$0xff]   ;;  %v2722_v25 = vld [vmem:[#allocation2 + $0xcc] ss:$16 sps:$4 sm:$0xff]  }
  0x1b   :  { %v2724_v26 = vld [vmem:[#allocation2 + $0xc0] ss:$16 sps:$4 sm:$0xff]   ;;  %v2725_v27 = vld [vmem:[#allocation2 + $0xc8] ss:$16 sps:$4 sm:$0xff]   ;;  %v2726_v28 = vld [vmem:[#allocation2 + $0xe4] ss:$16 sps:$4 sm:$0xff]  }
  0x1c   :  { %1614 = vmatpush1.bf16.msra.mxu0 %v2700_v10  ;;  %1778 = vmatpush1.bf16.msra.mxu1 %v2701_v11  ;;  %v2728_v29 = vld [vmem:[#allocation2 + $0xec] ss:$16 sps:$4 sm:$0xff]   ;;  %v2730_v30 = vld [vmem:[#allocation2 + $0xe0] ss:$16 sps:$4 sm:$0xff]   ;;  %v2731_v31 = vld [vmem:[#allocation2 + $0xe8] ss:$16 sps:$4 sm:$0xff]  }
  0x1d   :  { %1615 = vmatprep.subr.bf16.mxu0 %v2702_v12  ;;  %1779 = vmatprep.subr.bf16.mxu1 %v2704_v13  ;;  %v2732_v32 = vld [vmem:[#allocation2 + $0x104] ss:$16 sps:$4 sm:$0xff]   ;;  %v2734_v33 = vld [vmem:[#allocation2 + $0x10c] ss:$16 sps:$4 sm:$0xff]   ;;  %v2736_v34 = vld [vmem:[#allocation2 + $0x100] ss:$16 sps:$4 sm:$0xff]  }
  0x1e   :  { %v2737_v35 = vld [vmem:[#allocation2 + $0x108] ss:$16 sps:$4 sm:$0xff]   ;;  %v2738_v36 = vld [vmem:[#allocation2 + $0x124] ss:$16 sps:$4 sm:$0xff]   ;;  %v2740_v37 = vld [vmem:[#allocation2 + $0x12c] ss:$16 sps:$4 sm:$0xff]  }
  0x1f   :  { %v2742_v38 = vld [vmem:[#allocation2 + $0x120] ss:$16 sps:$4 sm:$0xff]   ;;  %v2743_v39 = vld [vmem:[#allocation2 + $0x128] ss:$16 sps:$4 sm:$0xff]   ;;  %v2744_v40 = vld [vmem:[#allocation2 + $0x144] ss:$16 sps:$4 sm:$0xff]  }
  0x20   :  { %1616 = vmatpush1.bf16.msra.mxu0 %v2706_v14  ;;  %1780 = vmatpush1.bf16.msra.mxu1 %v2707_v15  ;;  %v2746_v41 = vld [vmem:[#allocation2 + $0x14c] ss:$16 sps:$4 sm:$0xff]   ;;  %v2748_v42 = vld [vmem:[#allocation2 + $0x140] ss:$16 sps:$4 sm:$0xff]   ;;  %v2749_v43 = vld [vmem:[#allocation2 + $0x148] ss:$16 sps:$4 sm:$0xff]  }
  0x21   :  { %1617 = vmatprep.subr.bf16.mxu0 %v2708_v16  ;;  %1781 = vmatprep.subr.bf16.mxu1 %v2710_v17  ;;  %v2750_v44 = vld [vmem:[#allocation2 + $0x164] ss:$16 sps:$4 sm:$0xff]   ;;  %v2752_v45 = vld [vmem:[#allocation2 + $0x16c] ss:$16 sps:$4 sm:$0xff]   ;;  %v2754_v47 = vld [vmem:[#allocation2 + $0x160] ss:$16 sps:$4 sm:$0xff]  }
  0x22   :  { %v36_v46 = vld [vmem:[%s3302_s0 + $0x8] sm:$0xff]  ;;  %v2756_v50 = vld [vmem:[#allocation2 + $0x184] ss:$16 sps:$4 sm:$0xff]   ;;  %v2760_v52 = vld [vmem:[#allocation2 + $0x180] ss:$16 sps:$4 sm:$0xff]  }
  0x23   :  { %v44_v48 = vpack.c.bf16 %v36_v46, %v36_v46  ;;  %v2755_v49 = vld [vmem:[#allocation2 + $0x168] ss:$16 sps:$4 sm:$0xff]   ;;  %v2758_v51 = vld [vmem:[#allocation2 + $0x18c] ss:$16 sps:$4 sm:$0xff]   ;;  %v2762_v54 = vld [vmem:[#allocation2 + $0x1a4] ss:$16 sps:$4 sm:$0xff]  }
  0x24   :  { %1618 = vmatpush1.bf16.msra.mxu0 %v2712_v18  ;;  %1782 = vmatpush1.bf16.msra.mxu1 %v2713_v19  ;;  %v2761_v53 = vld [vmem:[#allocation2 + $0x188] ss:$16 sps:$4 sm:$0xff]   ;;  %v2764_v55 = vld [vmem:[#allocation2 + $0x1ac] ss:$16 sps:$4 sm:$0xff]   ;;  %v2766_v56 = vld [vmem:[#allocation2 + $0x1a0] ss:$16 sps:$4 sm:$0xff]  }
  0x25   :  { %1619 = vmatprep.subr.bf16.mxu0 %v2714_v20  ;;  %1783 = vmatprep.subr.bf16.mxu1 %v2716_v21  ;;  %v2767_v57 = vld [vmem:[#allocation2 + $0x1a8] ss:$16 sps:$4 sm:$0xff]   ;;  %v2768_v58 = vld [vmem:[#allocation2 + $0x1c4] ss:$16 sps:$4 sm:$0xff]   ;;  %v2770_v59 = vld [vmem:[#allocation2 + $0x1cc] ss:$16 sps:$4 sm:$0xff]  }
  0x26   :  { %1641 = vmatprep.mubr.bf16.mxu0 %v44_v48  ;;  %1805 = vmatprep.mubr.bf16.mxu1 %v44_v48  ;;  %v2772_v60 = vld [vmem:[#allocation2 + $0x1c0] ss:$16 sps:$4 sm:$0xff]   ;;  %v2773_v61 = vld [vmem:[#allocation2 + $0x1c8] ss:$16 sps:$4 sm:$0xff]   ;;  %v2774_v62 = vld [vmem:[#allocation2 + $0x1e4] ss:$16 sps:$4 sm:$0xff]  }
  0x27   :  { %v2776_v63 = vld [vmem:[#allocation2 + $0x1ec] ss:$16 sps:$4 sm:$0xff]   ;;  %v2778_v0 = vld [vmem:[#allocation2 + $0x1e0] ss:$16 sps:$4 sm:$0xff]   ;;  %v2779_v1 = vld [vmem:[#allocation2 + $0x1e8] ss:$16 sps:$4 sm:$0xff]  }
  0x28   :  { %1620 = vmatpush1.bf16.msra.mxu0 %v2718_v22  ;;  %1784 = vmatpush1.bf16.msra.mxu1 %v2719_v23  ;;  %v35_v2 = vld [vmem:[%s3302_s0] sm:$0xff]  ;;  %v2785_v4 = vld [vmem:[#allocation2 + $0x20c] ss:$16 sps:$4 sm:$0xff]   ;;  %v2783_v7 = vld [vmem:[#allocation2 + $0x208] ss:$16 sps:$4 sm:$0xff]  }
  0x29   :  { %1621 = vmatprep.subr.bf16.mxu0 %v2720_v24  ;;  %1785 = vmatprep.subr.bf16.mxu1 %v2722_v25  ;;  %v2782_v3 = vld [vmem:[#allocation2 + $0x204] ss:$16 sps:$4 sm:$0xff]   ;;  %v43_v5 = vpack.c.bf16 %v35_v2, %v35_v2  ;;  %v2780_v6 = vld [vmem:[#allocation2 + $0x200] ss:$16 sps:$4 sm:$0xff]   ;;  %v2791_v9 = vld [vmem:[#allocation2 + $0x22c] ss:$16 sps:$4 sm:$0xff]  }
  0x2a   :  { %v2788_v8 = vld [vmem:[#allocation2 + $0x224] ss:$16 sps:$4 sm:$0xff]   ;;  %v2786_v10 = vld [vmem:[#allocation2 + $0x220] ss:$16 sps:$4 sm:$0xff]   ;;  %v2789_v11 = vld [vmem:[#allocation2 + $0x228] ss:$16 sps:$4 sm:$0xff]  }
  0x2b   :  { %v2794_v12 = vld [vmem:[#allocation2 + $0x244] ss:$16 sps:$4 sm:$0xff]   ;;  %v2797_v13 = vld [vmem:[#allocation2 + $0x24c] ss:$16 sps:$4 sm:$0xff]   ;;  %v2792_v14 = vld [vmem:[#allocation2 + $0x240] ss:$16 sps:$4 sm:$0xff]  }
  0x2c   :  { %1622 = vmatpush1.bf16.msra.mxu0 %v2724_v26  ;;  %1786 = vmatpush1.bf16.msra.mxu1 %v2725_v27  ;;  %v2795_v15 = vld [vmem:[#allocation2 + $0x248] ss:$16 sps:$4 sm:$0xff]   ;;  %v2800_v16 = vld [vmem:[#allocation2 + $0x264] ss:$16 sps:$4 sm:$0xff]   ;;  %v2803_v17 = vld [vmem:[#allocation2 + $0x26c] ss:$16 sps:$4 sm:$0xff]  }
  0x2d   :  { %1623 = vmatprep.subr.bf16.mxu0 %v2726_v28  ;;  %1787 = vmatprep.subr.bf16.mxu1 %v2728_v29  ;;  %v2798_v18 = vld [vmem:[#allocation2 + $0x260] ss:$16 sps:$4 sm:$0xff]   ;;  %v2801_v19 = vld [vmem:[#allocation2 + $0x268] ss:$16 sps:$4 sm:$0xff]   ;;  %v2806_v20 = vld [vmem:[#allocation2 + $0x284] ss:$16 sps:$4 sm:$0xff]  }
  0x2e   :  { %v2809_v21 = vld [vmem:[#allocation2 + $0x28c] ss:$16 sps:$4 sm:$0xff]   ;;  %v2804_v22 = vld [vmem:[#allocation2 + $0x280] ss:$16 sps:$4 sm:$0xff]   ;;  %v2807_v23 = vld [vmem:[#allocation2 + $0x288] ss:$16 sps:$4 sm:$0xff]  }
  0x2f   :  { %v2812_v24 = vld [vmem:[#allocation2 + $0x2a4] ss:$16 sps:$4 sm:$0xff]   ;;  %v2815_v25 = vld [vmem:[#allocation2 + $0x2ac] ss:$16 sps:$4 sm:$0xff]   ;;  %v2810_v26 = vld [vmem:[#allocation2 + $0x2a0] ss:$16 sps:$4 sm:$0xff]  }
  0x30   :  { %1624 = vmatpush1.bf16.msra.mxu0 %v2730_v30  ;;  %1788 = vmatpush1.bf16.msra.mxu1 %v2731_v31  ;;  %v2813_v27 = vld [vmem:[#allocation2 + $0x2a8] ss:$16 sps:$4 sm:$0xff]   ;;  %v2818_v28 = vld [vmem:[#allocation2 + $0x2c4] ss:$16 sps:$4 sm:$0xff]   ;;  %v2821_v29 = vld [vmem:[#allocation2 + $0x2cc] ss:$16 sps:$4 sm:$0xff]  }
  0x31   :  { %1625 = vmatprep.subr.bf16.mxu0 %v2732_v32  ;;  %1789 = vmatprep.subr.bf16.mxu1 %v2734_v33  ;;  %v38_v30 = vld [vmem:[%s3302_s0 + $0x18] sm:$0xff]  ;;  %v2816_v31 = vld [vmem:[#allocation2 + $0x2c0] ss:$16 sps:$4 sm:$0xff]   ;;  %v2842_v46 = vld [vmem:[#allocation2 + $0x344] ss:$16 sps:$4 sm:$0xff]  }
  0x32   :  { %v46_v32 = vpack.c.bf16 %v38_v30, %v38_v30  ;;  %v2819_v33 = vld [vmem:[#allocation2 + $0x2c8] ss:$16 sps:$4 sm:$0xff]   ;;  %v2840_v48 = vld [vmem:[#allocation2 + $0x340] ss:$16 sps:$4 sm:$0xff]   ;;  %v2872_v2 = vld [vmem:[#allocation2 + $0x3e4] ss:$16 sps:$4 sm:$0xff]  }
  0x33   :  { %v2908_v30 = vld [vmem:[#allocation2 + $0x4a4] ss:$16 sps:$4 sm:$0xff]  }
  0x34   :  { %1626 = vmatpush1.bf16.msra.mxu0 %v2736_v34  ;;  %1790 = vmatpush1.bf16.msra.mxu1 %v2737_v35  ;;  %v2824_v34 = vld [vmem:[#allocation2 + $0x2e4] ss:$16 sps:$4 sm:$0xff]   ;;  %v2827_v35 = vld [vmem:[#allocation2 + $0x2ec] ss:$16 sps:$4 sm:$0xff]  }
  0x35   :  { %1627 = vmatprep.subr.bf16.mxu0 %v2738_v36  ;;  %1791 = vmatprep.subr.bf16.mxu1 %v2740_v37  ;;  %v2822_v36 = vld [vmem:[#allocation2 + $0x2e0] ss:$16 sps:$4 sm:$0xff]   ;;  %v2825_v37 = vld [vmem:[#allocation2 + $0x2e8] ss:$16 sps:$4 sm:$0xff]  }
  0x38   :  { %1628 = vmatpush1.bf16.msra.mxu0 %v2742_v38  ;;  %1792 = vmatpush1.bf16.msra.mxu1 %v2743_v39  ;;  %v2830_v38 = vld [vmem:[#allocation2 + $0x304] ss:$16 sps:$4 sm:$0xff]   ;;  %v2833_v39 = vld [vmem:[#allocation2 + $0x30c] ss:$16 sps:$4 sm:$0xff]  }
  0x39   :  { %1629 = vmatprep.subr.bf16.mxu0 %v2744_v40  ;;  %1793 = vmatprep.subr.bf16.mxu1 %v2746_v41  ;;  %v2828_v40 = vld [vmem:[#allocation2 + $0x300] ss:$16 sps:$4 sm:$0xff]   ;;  %v2831_v41 = vld [vmem:[#allocation2 + $0x308] ss:$16 sps:$4 sm:$0xff]  }
  0x3c   :  { %1630 = vmatpush1.bf16.msra.mxu0 %v2748_v42  ;;  %1794 = vmatpush1.bf16.msra.mxu1 %v2749_v43  ;;  %v2836_v42 = vld [vmem:[#allocation2 + $0x324] ss:$16 sps:$4 sm:$0xff]   ;;  %v2839_v43 = vld [vmem:[#allocation2 + $0x32c] ss:$16 sps:$4 sm:$0xff]  }
  0x3d   :  { %1631 = vmatprep.subr.bf16.mxu0 %v2750_v44  ;;  %1795 = vmatprep.subr.bf16.mxu1 %v2752_v45  ;;  %v2834_v44 = vld [vmem:[#allocation2 + $0x320] ss:$16 sps:$4 sm:$0xff]   ;;  %v2837_v45 = vld [vmem:[#allocation2 + $0x328] ss:$16 sps:$4 sm:$0xff]  }
  0x40   :  { %1632 = vmatpush1.bf16.msra.mxu0 %v2754_v47  ;;  %1796 = vmatpush1.bf16.msra.mxu1 %v2755_v49  ;;  %v2845_v47 = vld [vmem:[#allocation2 + $0x34c] ss:$16 sps:$4 sm:$0xff]   ;;  %v2843_v49 = vld [vmem:[#allocation2 + $0x348] ss:$16 sps:$4 sm:$0xff]  }
  0x41   :  { %1633 = vmatprep.subr.bf16.mxu0 %v2756_v50  ;;  %1797 = vmatprep.subr.bf16.mxu1 %v2758_v51  ;;  %v2848_v50 = vld [vmem:[#allocation2 + $0x364] ss:$16 sps:$4 sm:$0xff]   ;;  %v2851_v51 = vld [vmem:[#allocation2 + $0x36c] ss:$16 sps:$4 sm:$0xff]  }
  0x44   :  { %1634 = vmatpush1.bf16.msra.mxu0 %v2760_v52  ;;  %1798 = vmatpush1.bf16.msra.mxu1 %v2761_v53  ;;  %v2846_v52 = vld [vmem:[#allocation2 + $0x360] ss:$16 sps:$4 sm:$0xff]   ;;  %v2849_v53 = vld [vmem:[#allocation2 + $0x368] ss:$16 sps:$4 sm:$0xff]  }
  0x45   :  { %1635 = vmatprep.subr.bf16.mxu0 %v2762_v54  ;;  %1799 = vmatprep.subr.bf16.mxu1 %v2764_v55  ;;  %v2854_v54 = vld [vmem:[#allocation2 + $0x384] ss:$16 sps:$4 sm:$0xff]   ;;  %v2857_v55 = vld [vmem:[#allocation2 + $0x38c] ss:$16 sps:$4 sm:$0xff]  }
  0x48   :  { %1636 = vmatpush1.bf16.msra.mxu0 %v2766_v56  ;;  %1800 = vmatpush1.bf16.msra.mxu1 %v2767_v57  ;;  %v2852_v56 = vld [vmem:[#allocation2 + $0x380] ss:$16 sps:$4 sm:$0xff]   ;;  %v2855_v57 = vld [vmem:[#allocation2 + $0x388] ss:$16 sps:$4 sm:$0xff]  }
  0x49   :  { %1637 = vmatprep.subr.bf16.mxu0 %v2768_v58  ;;  %1801 = vmatprep.subr.bf16.mxu1 %v2770_v59  ;;  %v2860_v58 = vld [vmem:[#allocation2 + $0x3a4] ss:$16 sps:$4 sm:$0xff]   ;;  %v2863_v59 = vld [vmem:[#allocation2 + $0x3ac] ss:$16 sps:$4 sm:$0xff]  }
  0x4c   :  { %1638 = vmatpush1.bf16.msra.mxu0 %v2772_v60  ;;  %1802 = vmatpush1.bf16.msra.mxu1 %v2773_v61  ;;  %v2858_v60 = vld [vmem:[#allocation2 + $0x3a0] ss:$16 sps:$4 sm:$0xff]   ;;  %v2861_v61 = vld [vmem:[#allocation2 + $0x3a8] ss:$16 sps:$4 sm:$0xff]  }
  0x4d   :  { %1639 = vmatprep.subr.bf16.mxu0 %v2774_v62  ;;  %1803 = vmatprep.subr.bf16.mxu1 %v2776_v63  ;;  %v2866_v62 = vld [vmem:[#allocation2 + $0x3c4] ss:$16 sps:$4 sm:$0xff]   ;;  %v2869_v63 = vld [vmem:[#allocation2 + $0x3cc] ss:$16 sps:$4 sm:$0xff]  }
  0x50   :  { %1640 = vmatpush1.bf16.msra.mxu0 %v2778_v0  ;;  %1804 = vmatpush1.bf16.msra.mxu1 %v2779_v1  ;;  %v2864_v0 = vld [vmem:[#allocation2 + $0x3c0] ss:$16 sps:$4 sm:$0xff]   ;;  %v2867_v1 = vld [vmem:[#allocation2 + $0x3c8] ss:$16 sps:$4 sm:$0xff]  }
  0x51   :  { %1650 = vmatprep.subr.bf16.mxu0 %v2782_v3  ;;  %1814 = vmatprep.subr.bf16.mxu1 %v2785_v4  ;;  %v2875_v3 = vld [vmem:[#allocation2 + $0x3ec] ss:$16 sps:$4 sm:$0xff]   ;;  %v2870_v4 = vld [vmem:[#allocation2 + $0x3e0] ss:$16 sps:$4 sm:$0xff]  }
  0x53   :  { %1642 = vmatmul.mubr.bf16.vlgmr.msra.gmra.mrb[0].mxu0 %v43_v5  ;;  %1806 = vmatmul.mubr.bf16.vlgmr.msra.gmra.mrb[0].mxu1 %v43_v5  ;;  %v2873_v5 = vld [vmem:[#allocation2 + $0x3e8] ss:$16 sps:$4 sm:$0xff]  }
  0x54   :  { %1651 = vmatpush1.bf16.msra.mxu0 %v2780_v6  ;;  %1815 = vmatpush1.bf16.msra.mxu1 %v2783_v7  ;;  %v2878_v6 = vld [vmem:[#allocation2 + $0x404] ss:$16 sps:$4 sm:$0xff]  }
  0x55   :  { %1652 = vmatprep.subr.bf16.mxu0 %v2788_v8  ;;  %1816 = vmatprep.subr.bf16.mxu1 %v2791_v9  ;;  %v37_v7 = vld [vmem:[%s3302_s0 + $0x10] sm:$0xff]  ;;  %v2881_v8 = vld [vmem:[#allocation2 + $0x40c] ss:$16 sps:$4 sm:$0xff]  }
  0x56   :  { %1682 = vmatprep.mubr.bf16.mxu0 %v46_v32  ;;  %1846 = vmatprep.mubr.bf16.mxu1 %v46_v32  ;;  %v2876_v9 = vld [vmem:[#allocation2 + $0x400] ss:$16 sps:$4 sm:$0xff]  }
  0x57   :  { %v2906_v32 = vld [vmem:[#allocation2 + $0x4a0] ss:$16 sps:$4 sm:$0xff]  }
  0x58   :  { %1653 = vmatpush1.bf16.msra.mxu0 %v2786_v10  ;;  %1817 = vmatpush1.bf16.msra.mxu1 %v2789_v11  ;;  %v2879_v10 = vld [vmem:[#allocation2 + $0x408] ss:$16 sps:$4 sm:$0xff]   ;;  %v45_v11 = vpack.c.bf16 %v37_v7, %v37_v7  ;;  %v2971_v7 = vld [vmem:[#allocation2 + $0x5ec] ss:$16 sps:$4 sm:$0xff]  }
  0x59   :  { %1654 = vmatprep.subr.bf16.mxu0 %v2794_v12  ;;  %1818 = vmatprep.subr.bf16.mxu1 %v2797_v13  ;;  %v2884_v12 = vld [vmem:[#allocation2 + $0x424] ss:$16 sps:$4 sm:$0xff]   ;;  %v2887_v13 = vld [vmem:[#allocation2 + $0x42c] ss:$16 sps:$4 sm:$0xff]  }
  0x5c   :  { %1655 = vmatpush1.bf16.msra.mxu0 %v2792_v14  ;;  %1819 = vmatpush1.bf16.msra.mxu1 %v2795_v15  ;;  %v40_v14 = vld [vmem:[%s3302_s0 + $0x28] sm:$0xff] }
  0x5d   :  { %1656 = vmatprep.subr.bf16.mxu0 %v2800_v16  ;;  %1820 = vmatprep.subr.bf16.mxu1 %v2803_v17  ;;  %v48_v15 = vpack.c.bf16 %v40_v14, %v40_v14  ;;  %v2882_v16 = vld [vmem:[#allocation2 + $0x420] ss:$16 sps:$4 sm:$0xff]   ;;  %v2885_v17 = vld [vmem:[#allocation2 + $0x428] ss:$16 sps:$4 sm:$0xff]  }
  0x5e   :  { %v2975_v14 = vld [vmem:[#allocation2 + $0x608] ss:$16 sps:$4 sm:$0xff]  }
  0x60   :  { %1657 = vmatpush1.bf16.msra.mxu0 %v2798_v18  ;;  %1821 = vmatpush1.bf16.msra.mxu1 %v2801_v19  ;;  %v2890_v18 = vld [vmem:[#allocation2 + $0x444] ss:$16 sps:$4 sm:$0xff]   ;;  %v2893_v19 = vld [vmem:[#allocation2 + $0x44c] ss:$16 sps:$4 sm:$0xff]  }
  0x61   :  { %1658 = vmatprep.subr.bf16.mxu0 %v2806_v20  ;;  %1822 = vmatprep.subr.bf16.mxu1 %v2809_v21  ;;  %v2888_v20 = vld [vmem:[#allocation2 + $0x440] ss:$16 sps:$4 sm:$0xff]   ;;  %v2891_v21 = vld [vmem:[#allocation2 + $0x448] ss:$16 sps:$4 sm:$0xff]  }
  0x64   :  { %1659 = vmatpush1.bf16.msra.mxu0 %v2804_v22  ;;  %1823 = vmatpush1.bf16.msra.mxu1 %v2807_v23  ;;  %v2896_v22 = vld [vmem:[#allocation2 + $0x464] ss:$16 sps:$4 sm:$0xff]   ;;  %v2899_v23 = vld [vmem:[#allocation2 + $0x46c] ss:$16 sps:$4 sm:$0xff]  }
  0x65   :  { %1660 = vmatprep.subr.bf16.mxu0 %v2812_v24  ;;  %1824 = vmatprep.subr.bf16.mxu1 %v2815_v25  ;;  %v2894_v24 = vld [vmem:[#allocation2 + $0x460] ss:$16 sps:$4 sm:$0xff]   ;;  %v2897_v25 = vld [vmem:[#allocation2 + $0x468] ss:$16 sps:$4 sm:$0xff]  }
  0x68   :  { %1661 = vmatpush1.bf16.msra.mxu0 %v2810_v26  ;;  %1825 = vmatpush1.bf16.msra.mxu1 %v2813_v27  ;;  %v2902_v26 = vld [vmem:[#allocation2 + $0x484] ss:$16 sps:$4 sm:$0xff]   ;;  %v2905_v27 = vld [vmem:[#allocation2 + $0x48c] ss:$16 sps:$4 sm:$0xff]  }
  0x69   :  { %1662 = vmatprep.subr.bf16.mxu0 %v2818_v28  ;;  %1826 = vmatprep.subr.bf16.mxu1 %v2821_v29  ;;  %v2900_v28 = vld [vmem:[#allocation2 + $0x480] ss:$16 sps:$4 sm:$0xff]   ;;  %v2903_v29 = vld [vmem:[#allocation2 + $0x488] ss:$16 sps:$4 sm:$0xff]  }
  0x6c   :  { %1663 = vmatpush1.bf16.msra.mxu0 %v2816_v31  ;;  %1827 = vmatpush1.bf16.msra.mxu1 %v2819_v33  ;;  %v2911_v31 = vld [vmem:[#allocation2 + $0x4ac] ss:$16 sps:$4 sm:$0xff]   ;;  %v2909_v33 = vld [vmem:[#allocation2 + $0x4a8] ss:$16 sps:$4 sm:$0xff]  }
  0x6d   :  { %1664 = vmatprep.subr.bf16.mxu0 %v2824_v34  ;;  %1828 = vmatprep.subr.bf16.mxu1 %v2827_v35  ;;  %v2914_v34 = vld [vmem:[#allocation2 + $0x4c4] ss:$16 sps:$4 sm:$0xff]   ;;  %v2917_v35 = vld [vmem:[#allocation2 + $0x4cc] ss:$16 sps:$4 sm:$0xff]  }
  0x70   :  { %1665 = vmatpush1.bf16.msra.mxu0 %v2822_v36  ;;  %1829 = vmatpush1.bf16.msra.mxu1 %v2825_v37  ;;  %v2912_v36 = vld [vmem:[#allocation2 + $0x4c0] ss:$16 sps:$4 sm:$0xff]   ;;  %v2915_v37 = vld [vmem:[#allocation2 + $0x4c8] ss:$16 sps:$4 sm:$0xff]  }
  0x71   :  { %1666 = vmatprep.subr.bf16.mxu0 %v2830_v38  ;;  %1830 = vmatprep.subr.bf16.mxu1 %v2833_v39  ;;  %v2920_v38 = vld [vmem:[#allocation2 + $0x4e4] ss:$16 sps:$4 sm:$0xff]   ;;  %v2923_v39 = vld [vmem:[#allocation2 + $0x4ec] ss:$16 sps:$4 sm:$0xff]  }
  0x74   :  { %1667 = vmatpush1.bf16.msra.mxu0 %v2828_v40  ;;  %1831 = vmatpush1.bf16.msra.mxu1 %v2831_v41  ;;  %v2918_v40 = vld [vmem:[#allocation2 + $0x4e0] ss:$16 sps:$4 sm:$0xff]   ;;  %v2921_v41 = vld [vmem:[#allocation2 + $0x4e8] ss:$16 sps:$4 sm:$0xff]  }
  0x75   :  { %1668 = vmatprep.subr.bf16.mxu0 %v2836_v42  ;;  %1832 = vmatprep.subr.bf16.mxu1 %v2839_v43  ;;  %v2926_v42 = vld [vmem:[#allocation2 + $0x504] ss:$16 sps:$4 sm:$0xff]   ;;  %v2929_v43 = vld [vmem:[#allocation2 + $0x50c] ss:$16 sps:$4 sm:$0xff]  }
  0x78   :  { %1669 = vmatpush1.bf16.msra.mxu0 %v2834_v44  ;;  %1833 = vmatpush1.bf16.msra.mxu1 %v2837_v45  ;;  %v2924_v44 = vld [vmem:[#allocation2 + $0x500] ss:$16 sps:$4 sm:$0xff]   ;;  %v2927_v45 = vld [vmem:[#allocation2 + $0x508] ss:$16 sps:$4 sm:$0xff]  }
  0x79   :  { %1670 = vmatprep.subr.bf16.mxu0 %v2842_v46  ;;  %1834 = vmatprep.subr.bf16.mxu1 %v2845_v47  ;;  %v2932_v46 = vld [vmem:[#allocation2 + $0x524] ss:$16 sps:$4 sm:$0xff]   ;;  %v2935_v47 = vld [vmem:[#allocation2 + $0x52c] ss:$16 sps:$4 sm:$0xff]  }
  0x7c   :  { %1671 = vmatpush1.bf16.msra.mxu0 %v2840_v48  ;;  %1835 = vmatpush1.bf16.msra.mxu1 %v2843_v49  ;;  %v2930_v48 = vld [vmem:[#allocation2 + $0x520] ss:$16 sps:$4 sm:$0xff]   ;;  %v2933_v49 = vld [vmem:[#allocation2 + $0x528] ss:$16 sps:$4 sm:$0xff]  }
  0x7d   :  { %1672 = vmatprep.subr.bf16.mxu0 %v2848_v50  ;;  %1836 = vmatprep.subr.bf16.mxu1 %v2851_v51  ;;  %v2938_v50 = vld [vmem:[#allocation2 + $0x544] ss:$16 sps:$4 sm:$0xff]   ;;  %v2941_v51 = vld [vmem:[#allocation2 + $0x54c] ss:$16 sps:$4 sm:$0xff]  }
  0x80   :  { %1673 = vmatpush1.bf16.msra.mxu0 %v2846_v52  ;;  %1837 = vmatpush1.bf16.msra.mxu1 %v2849_v53  ;;  %v2936_v52 = vld [vmem:[#allocation2 + $0x540] ss:$16 sps:$4 sm:$0xff]   ;;  %v2939_v53 = vld [vmem:[#allocation2 + $0x548] ss:$16 sps:$4 sm:$0xff]  }
  0x81   :  { %1674 = vmatprep.subr.bf16.mxu0 %v2854_v54  ;;  %1838 = vmatprep.subr.bf16.mxu1 %v2857_v55  ;;  %v2944_v54 = vld [vmem:[#allocation2 + $0x564] ss:$16 sps:$4 sm:$0xff]   ;;  %v2947_v55 = vld [vmem:[#allocation2 + $0x56c] ss:$16 sps:$4 sm:$0xff]  }
  0x84   :  { %1675 = vmatpush1.bf16.msra.mxu0 %v2852_v56  ;;  %1839 = vmatpush1.bf16.msra.mxu1 %v2855_v57  ;;  %v2942_v56 = vld [vmem:[#allocation2 + $0x560] ss:$16 sps:$4 sm:$0xff]   ;;  %v2945_v57 = vld [vmem:[#allocation2 + $0x568] ss:$16 sps:$4 sm:$0xff]  }
  0x85   :  { %1676 = vmatprep.subr.bf16.mxu0 %v2860_v58  ;;  %1840 = vmatprep.subr.bf16.mxu1 %v2863_v59  ;;  %v2950_v58 = vld [vmem:[#allocation2 + $0x584] ss:$16 sps:$4 sm:$0xff]   ;;  %v2953_v59 = vld [vmem:[#allocation2 + $0x58c] ss:$16 sps:$4 sm:$0xff]  }
  0x88   :  { %1677 = vmatpush1.bf16.msra.mxu0 %v2858_v60  ;;  %1841 = vmatpush1.bf16.msra.mxu1 %v2861_v61  ;;  %v2948_v60 = vld [vmem:[#allocation2 + $0x580] ss:$16 sps:$4 sm:$0xff]   ;;  %v2951_v61 = vld [vmem:[#allocation2 + $0x588] ss:$16 sps:$4 sm:$0xff]  }
  0x89   :  { %1678 = vmatprep.subr.bf16.mxu0 %v2866_v62  ;;  %1842 = vmatprep.subr.bf16.mxu1 %v2869_v63  ;;  %v2956_v62 = vld [vmem:[#allocation2 + $0x5a4] ss:$16 sps:$4 sm:$0xff]   ;;  %v2959_v63 = vld [vmem:[#allocation2 + $0x5ac] ss:$16 sps:$4 sm:$0xff]  }
  0x8c   :  { %1679 = vmatpush1.bf16.msra.mxu0 %v2864_v0  ;;  %1843 = vmatpush1.bf16.msra.mxu1 %v2867_v1  ;;  %v2954_v0 = vld [vmem:[#allocation2 + $0x5a0] ss:$16 sps:$4 sm:$0xff]   ;;  %v2957_v1 = vld [vmem:[#allocation2 + $0x5a8] ss:$16 sps:$4 sm:$0xff]  }
  0x8d   :  { %1680 = vmatprep.subr.bf16.mxu0 %v2872_v2  ;;  %1844 = vmatprep.subr.bf16.mxu1 %v2875_v3  ;;  %v2962_v2 = vld [vmem:[#allocation2 + $0x5c4] ss:$16 sps:$4 sm:$0xff]   ;;  %v2965_v3 = vld [vmem:[#allocation2 + $0x5cc] ss:$16 sps:$4 sm:$0xff]  }
  0x90   :  { %1681 = vmatpush1.bf16.msra.mxu0 %v2870_v4  ;;  %1845 = vmatpush1.bf16.msra.mxu1 %v2873_v5  ;;  %v2960_v4 = vld [vmem:[#allocation2 + $0x5c0] ss:$16 sps:$4 sm:$0xff]   ;;  %v2963_v5 = vld [vmem:[#allocation2 + $0x5c8] ss:$16 sps:$4 sm:$0xff]  }
  0x91   :  { %1691 = vmatprep.subr.bf16.mxu0 %v2878_v6  ;;  %1855 = vmatprep.subr.bf16.mxu1 %v2881_v8  ;;  %v2968_v6 = vld [vmem:[#allocation2 + $0x5e4] ss:$16 sps:$4 sm:$0xff]   ;;  %v2966_v8 = vld [vmem:[#allocation2 + $0x5e0] ss:$16 sps:$4 sm:$0xff]  }
  0x93   :  { %1683 = vmatmul.mubr.bf16.vlgmr.msra.gmra.mrb[0].mxu0 %v45_v11  ;;  %1847 = vmatmul.mubr.bf16.vlgmr.msra.gmra.mrb[0].mxu1 %v45_v11  ;;  %v39_v11 = vld [vmem:[%s3302_s0 + $0x20] sm:$0xff] }
  0x94   :  { %1692 = vmatpush1.bf16.msra.mxu0 %v2876_v9  ;;  %1856 = vmatpush1.bf16.msra.mxu1 %v2879_v10  ;;  %v2969_v9 = vld [vmem:[#allocation2 + $0x5e8] ss:$16 sps:$4 sm:$0xff]   ;;  %v2974_v10 = vld [vmem:[#allocation2 + $0x604] ss:$16 sps:$4 sm:$0xff]  }
  0x95   :  { %1693 = vmatprep.subr.bf16.mxu0 %v2884_v12  ;;  %1857 = vmatprep.subr.bf16.mxu1 %v2887_v13  ;;  %v2977_v12 = vld [vmem:[#allocation2 + $0x60c] ss:$16 sps:$4 sm:$0xff]   ;;  %v2972_v13 = vld [vmem:[#allocation2 + $0x600] ss:$16 sps:$4 sm:$0xff]  }
  0x96   :  { %1723 = vmatprep.mubr.bf16.mxu0 %v48_v15  ;;  %1887 = vmatprep.mubr.bf16.mxu1 %v48_v15  ;;  %v47_v15 = vpack.c.bf16 %v39_v11, %v39_v11  ;;  %v3067_v11 = vld [vmem:[#allocation2 + $0x7ec] ss:$16 sps:$4 sm:$0xff]  }
  0x98   :  { %1694 = vmatpush1.bf16.msra.mxu0 %v2882_v16  ;;  %1858 = vmatpush1.bf16.msra.mxu1 %v2885_v17  ;;  %v42_v16 = vld [vmem:[%s3302_s0 + $0x38] sm:$0xff]  ;;  %v2980_v17 = vld [vmem:[#allocation2 + $0x624] ss:$16 sps:$4 sm:$0xff]  }
  0x99   :  { %1695 = vmatprep.subr.bf16.mxu0 %v2890_v18  ;;  %1859 = vmatprep.subr.bf16.mxu1 %v2893_v19  ;;  %v2983_v18 = vld [vmem:[#allocation2 + $0x62c] ss:$16 sps:$4 sm:$0xff]   ;;  %v2978_v19 = vld [vmem:[#allocation2 + $0x620] ss:$16 sps:$4 sm:$0xff]  }
  0x9c   :  { %1696 = vmatpush1.bf16.msra.mxu0 %v2888_v20  ;;  %1860 = vmatpush1.bf16.msra.mxu1 %v2891_v21  ;;  %v2981_v20 = vld [vmem:[#allocation2 + $0x628] ss:$16 sps:$4 sm:$0xff]   ;;  %v50_v21 = vpack.c.bf16 %v42_v16, %v42_v16  ;;  %v3069_v16 = vld [vmem:[%s3305_s3 + $0xc0] sm:$0xff]  }
  0x9d   :  { %1697 = vmatprep.subr.bf16.mxu0 %v2896_v22  ;;  %1861 = vmatprep.subr.bf16.mxu1 %v2899_v23  ;;  %v2986_v22 = vld [vmem:[#allocation2 + $0x644] ss:$16 sps:$4 sm:$0xff]   ;;  %v2989_v23 = vld [vmem:[#allocation2 + $0x64c] ss:$16 sps:$4 sm:$0xff]  }
  0xa0   :  { %1698 = vmatpush1.bf16.msra.mxu0 %v2894_v24  ;;  %1862 = vmatpush1.bf16.msra.mxu1 %v2897_v25  ;;  %v2984_v24 = vld [vmem:[#allocation2 + $0x640] ss:$16 sps:$4 sm:$0xff]   ;;  %v2987_v25 = vld [vmem:[#allocation2 + $0x648] ss:$16 sps:$4 sm:$0xff]  }
  0xa1   :  { %1699 = vmatprep.subr.bf16.mxu0 %v2902_v26  ;;  %1863 = vmatprep.subr.bf16.mxu1 %v2905_v27  ;;  %v2992_v26 = vld [vmem:[#allocation2 + $0x664] ss:$16 sps:$4 sm:$0xff]   ;;  %v2995_v27 = vld [vmem:[#allocation2 + $0x66c] ss:$16 sps:$4 sm:$0xff]  }
  0xa4   :  { %1700 = vmatpush1.bf16.msra.mxu0 %v2900_v28  ;;  %1864 = vmatpush1.bf16.msra.mxu1 %v2903_v29  ;;  %v2990_v28 = vld [vmem:[#allocation2 + $0x660] ss:$16 sps:$4 sm:$0xff]   ;;  %v2993_v29 = vld [vmem:[#allocation2 + $0x668] ss:$16 sps:$4 sm:$0xff]  }
  0xa5   :  { %1701 = vmatprep.subr.bf16.mxu0 %v2908_v30  ;;  %1865 = vmatprep.subr.bf16.mxu1 %v2911_v31  ;;  %v2998_v30 = vld [vmem:[#allocation2 + $0x684] ss:$16 sps:$4 sm:$0xff]   ;;  %v3001_v31 = vld [vmem:[#allocation2 + $0x68c] ss:$16 sps:$4 sm:$0xff]  }
  0xa8   :  { %1702 = vmatpush1.bf16.msra.mxu0 %v2906_v32  ;;  %1866 = vmatpush1.bf16.msra.mxu1 %v2909_v33  ;;  %v2996_v32 = vld [vmem:[#allocation2 + $0x680] ss:$16 sps:$4 sm:$0xff]   ;;  %v2999_v33 = vld [vmem:[#allocation2 + $0x688] ss:$16 sps:$4 sm:$0xff]  }
  0xa9   :  { %1703 = vmatprep.subr.bf16.mxu0 %v2914_v34  ;;  %1867 = vmatprep.subr.bf16.mxu1 %v2917_v35  ;;  %v3004_v34 = vld [vmem:[#allocation2 + $0x6a4] ss:$16 sps:$4 sm:$0xff]   ;;  %v3007_v35 = vld [vmem:[#allocation2 + $0x6ac] ss:$16 sps:$4 sm:$0xff]  }
  0xac   :  { %1704 = vmatpush1.bf16.msra.mxu0 %v2912_v36  ;;  %1868 = vmatpush1.bf16.msra.mxu1 %v2915_v37  ;;  %v3002_v36 = vld [vmem:[#allocation2 + $0x6a0] ss:$16 sps:$4 sm:$0xff]   ;;  %v3005_v37 = vld [vmem:[#allocation2 + $0x6a8] ss:$16 sps:$4 sm:$0xff]  }
  0xad   :  { %1705 = vmatprep.subr.bf16.mxu0 %v2920_v38  ;;  %1869 = vmatprep.subr.bf16.mxu1 %v2923_v39  ;;  %v3010_v38 = vld [vmem:[#allocation2 + $0x6c4] ss:$16 sps:$4 sm:$0xff]   ;;  %v3013_v39 = vld [vmem:[#allocation2 + $0x6cc] ss:$16 sps:$4 sm:$0xff]  }
  0xb0   :  { %1706 = vmatpush1.bf16.msra.mxu0 %v2918_v40  ;;  %1870 = vmatpush1.bf16.msra.mxu1 %v2921_v41  ;;  %v3008_v40 = vld [vmem:[#allocation2 + $0x6c0] ss:$16 sps:$4 sm:$0xff]   ;;  %v3011_v41 = vld [vmem:[#allocation2 + $0x6c8] ss:$16 sps:$4 sm:$0xff]  }
  0xb1   :  { %1707 = vmatprep.subr.bf16.mxu0 %v2926_v42  ;;  %1871 = vmatprep.subr.bf16.mxu1 %v2929_v43  ;;  %v3016_v42 = vld [vmem:[#allocation2 + $0x6e4] ss:$16 sps:$4 sm:$0xff]   ;;  %v3019_v43 = vld [vmem:[#allocation2 + $0x6ec] ss:$16 sps:$4 sm:$0xff]  }
  0xb4   :  { %1708 = vmatpush1.bf16.msra.mxu0 %v2924_v44  ;;  %1872 = vmatpush1.bf16.msra.mxu1 %v2927_v45  ;;  %v3014_v44 = vld [vmem:[#allocation2 + $0x6e0] ss:$16 sps:$4 sm:$0xff]   ;;  %v3017_v45 = vld [vmem:[#allocation2 + $0x6e8] ss:$16 sps:$4 sm:$0xff]  }
  0xb5   :  { %1709 = vmatprep.subr.bf16.mxu0 %v2932_v46  ;;  %1873 = vmatprep.subr.bf16.mxu1 %v2935_v47  ;;  %v3022_v46 = vld [vmem:[#allocation2 + $0x704] ss:$16 sps:$4 sm:$0xff]   ;;  %v3025_v47 = vld [vmem:[#allocation2 + $0x70c] ss:$16 sps:$4 sm:$0xff]  }
  0xb8   :  { %1710 = vmatpush1.bf16.msra.mxu0 %v2930_v48  ;;  %1874 = vmatpush1.bf16.msra.mxu1 %v2933_v49  ;;  %v3020_v48 = vld [vmem:[#allocation2 + $0x700] ss:$16 sps:$4 sm:$0xff]   ;;  %v3023_v49 = vld [vmem:[#allocation2 + $0x708] ss:$16 sps:$4 sm:$0xff]  }
  0xb9   :  { %1711 = vmatprep.subr.bf16.mxu0 %v2938_v50  ;;  %1875 = vmatprep.subr.bf16.mxu1 %v2941_v51  ;;  %v3028_v50 = vld [vmem:[#allocation2 + $0x724] ss:$16 sps:$4 sm:$0xff]   ;;  %v3031_v51 = vld [vmem:[#allocation2 + $0x72c] ss:$16 sps:$4 sm:$0xff]  }
  0xbc   :  { %1712 = vmatpush1.bf16.msra.mxu0 %v2936_v52  ;;  %1876 = vmatpush1.bf16.msra.mxu1 %v2939_v53  ;;  %v3026_v52 = vld [vmem:[#allocation2 + $0x720] ss:$16 sps:$4 sm:$0xff]   ;;  %v3029_v53 = vld [vmem:[#allocation2 + $0x728] ss:$16 sps:$4 sm:$0xff]  }
  0xbd   :  { %1713 = vmatprep.subr.bf16.mxu0 %v2944_v54  ;;  %1877 = vmatprep.subr.bf16.mxu1 %v2947_v55  ;;  %v3034_v54 = vld [vmem:[#allocation2 + $0x744] ss:$16 sps:$4 sm:$0xff]   ;;  %v3037_v55 = vld [vmem:[#allocation2 + $0x74c] ss:$16 sps:$4 sm:$0xff]  }
  0xc0   :  { %1714 = vmatpush1.bf16.msra.mxu0 %v2942_v56  ;;  %1878 = vmatpush1.bf16.msra.mxu1 %v2945_v57  ;;  %v3032_v56 = vld [vmem:[#allocation2 + $0x740] ss:$16 sps:$4 sm:$0xff]   ;;  %v3035_v57 = vld [vmem:[#allocation2 + $0x748] ss:$16 sps:$4 sm:$0xff]  }
  0xc1   :  { %1715 = vmatprep.subr.bf16.mxu0 %v2950_v58  ;;  %1879 = vmatprep.subr.bf16.mxu1 %v2953_v59  ;;  %v3040_v58 = vld [vmem:[#allocation2 + $0x764] ss:$16 sps:$4 sm:$0xff]   ;;  %v3043_v59 = vld [vmem:[#allocation2 + $0x76c] ss:$16 sps:$4 sm:$0xff]  }
  0xc4   :  { %1716 = vmatpush1.bf16.msra.mxu0 %v2948_v60  ;;  %1880 = vmatpush1.bf16.msra.mxu1 %v2951_v61  ;;  %v3038_v60 = vld [vmem:[#allocation2 + $0x760] ss:$16 sps:$4 sm:$0xff]   ;;  %v3041_v61 = vld [vmem:[#allocation2 + $0x768] ss:$16 sps:$4 sm:$0xff]  }
  0xc5   :  { %1717 = vmatprep.subr.bf16.mxu0 %v2956_v62  ;;  %1881 = vmatprep.subr.bf16.mxu1 %v2959_v63  ;;  %v3046_v62 = vld [vmem:[#allocation2 + $0x784] ss:$16 sps:$4 sm:$0xff]   ;;  %v3049_v63 = vld [vmem:[#allocation2 + $0x78c] ss:$16 sps:$4 sm:$0xff]  }
  0xc8   :  { %1718 = vmatpush1.bf16.msra.mxu0 %v2954_v0  ;;  %1882 = vmatpush1.bf16.msra.mxu1 %v2957_v1  ;;  %v3044_v0 = vld [vmem:[#allocation2 + $0x780] ss:$16 sps:$4 sm:$0xff]   ;;  %v3047_v1 = vld [vmem:[#allocation2 + $0x788] ss:$16 sps:$4 sm:$0xff]  }
  0xc9   :  { %1719 = vmatprep.subr.bf16.mxu0 %v2962_v2  ;;  %1883 = vmatprep.subr.bf16.mxu1 %v2965_v3  ;;  %v3052_v2 = vld [vmem:[#allocation2 + $0x7a4] ss:$16 sps:$4 sm:$0xff]   ;;  %v3055_v3 = vld [vmem:[#allocation2 + $0x7ac] ss:$16 sps:$4 sm:$0xff]  }
  0xcc   :  { %1720 = vmatpush1.bf16.msra.mxu0 %v2960_v4  ;;  %1884 = vmatpush1.bf16.msra.mxu1 %v2963_v5  ;;  %v3050_v4 = vld [vmem:[#allocation2 + $0x7a0] ss:$16 sps:$4 sm:$0xff]   ;;  %v3053_v5 = vld [vmem:[#allocation2 + $0x7a8] ss:$16 sps:$4 sm:$0xff]  }
  0xcd   :  { %1721 = vmatprep.subr.bf16.mxu0 %v2968_v6  ;;  %1885 = vmatprep.subr.bf16.mxu1 %v2971_v7  ;;  %v3058_v6 = vld [vmem:[#allocation2 + $0x7c4] ss:$16 sps:$4 sm:$0xff]   ;;  %v3061_v7 = vld [vmem:[#allocation2 + $0x7cc] ss:$16 sps:$4 sm:$0xff]  }
  0xd0   :  { %1722 = vmatpush1.bf16.msra.mxu0 %v2966_v8  ;;  %1886 = vmatpush1.bf16.msra.mxu1 %v2969_v9  ;;  %v3056_v8 = vld [vmem:[#allocation2 + $0x7c0] ss:$16 sps:$4 sm:$0xff]   ;;  %v3059_v9 = vld [vmem:[#allocation2 + $0x7c8] ss:$16 sps:$4 sm:$0xff]  }
  0xd1   :  { %1732 = vmatprep.subr.bf16.mxu0 %v2974_v10  ;;  %1896 = vmatprep.subr.bf16.mxu1 %v2977_v12  ;;  %v3064_v10 = vld [vmem:[#allocation2 + $0x7e4] ss:$16 sps:$4 sm:$0xff]   ;;  %v3062_v12 = vld [vmem:[#allocation2 + $0x7e0] ss:$16 sps:$4 sm:$0xff]  }
  0xd3   :  { %1724 = vmatmul.mubr.bf16.vlgmr.msra.gmra.mrb[0].mxu0 %v47_v15  ;;  %1888 = vmatmul.mubr.bf16.vlgmr.msra.gmra.mrb[0].mxu1 %v47_v15  ;;  %v3068_v15 = vld [vmem:[%s3305_s3 + $0x40] sm:$0xff]  }
  0xd4   :  { %1733 = vmatpush1.bf16.msra.mxu0 %v2972_v13  ;;  %1897 = vmatpush1.bf16.msra.mxu1 %v2975_v14  ;;  %v3065_v13 = vld [vmem:[#allocation2 + $0x7e8] ss:$16 sps:$4 sm:$0xff]   ;;  %v41_v14 = vld [vmem:[%s3302_s0 + $0x30] sm:$0xff] }
  0xd5   :  { %1734 = vmatprep.subr.bf16.mxu0 %v2980_v17  ;;  %1898 = vmatprep.subr.bf16.mxu1 %v2983_v18  ;;  %v49_v17 = vpack.c.bf16 %v41_v14, %v41_v14  ;;  %v3070_v18 = vld [vmem:[%s3305_s3] sm:$0xff]  }
  0xd6   :  { %1764 = vmatprep.mubr.bf16.mxu0 %v50_v21  ;;  %1928 = vmatprep.mubr.bf16.mxu1 %v50_v21  ;;  %v3073_v21 = vld [vmem:[%s3305_s3 + $0xc8] sm:$0xff]  }
  0xd8   :  { %1735 = vmatpush1.bf16.msra.mxu0 %v2978_v19  ;;  %1899 = vmatpush1.bf16.msra.mxu1 %v2981_v20  ;;  %v3071_v19 = vld [vmem:[%s3305_s3 + $0x80] sm:$0xff]   ;;  %v3072_v20 = vld [vmem:[%s3305_s3 + $0x48] sm:$0xff]  }
  0xd9   :  { %1736 = vmatprep.subr.bf16.mxu0 %v2986_v22  ;;  %1900 = vmatprep.subr.bf16.mxu1 %v2989_v23  ;;  %v3074_v22 = vld [vmem:[%s3305_s3 + $0x8] sm:$0xff]  }
  0xda   :  { %v3075_v23 = vld [vmem:[%s3305_s3 + $0x88] sm:$0xff]  }
  0xdc   :  { %1737 = vmatpush1.bf16.msra.mxu0 %v2984_v24  ;;  %1901 = vmatpush1.bf16.msra.mxu1 %v2987_v25  ;;  %v3076_v24 = vld [vmem:[%s3305_s3 + $0x50] sm:$0xff]  }
  0xdd   :  { %1738 = vmatprep.subr.bf16.mxu0 %v2992_v26  ;;  %1902 = vmatprep.subr.bf16.mxu1 %v2995_v27  ;;  %v3077_v25 = vld [vmem:[%s3305_s3 + $0xd0] sm:$0xff]  }
  0xde   :  { %v3078_v26 = vld [vmem:[%s3305_s3 + $0x10] sm:$0xff]  }
  0xdf   :  { %v3079_v27 = vld [vmem:[%s3305_s3 + $0x90] sm:$0xff]  }
  0xe0   :  { %1739 = vmatpush1.bf16.msra.mxu0 %v2990_v28  ;;  %1903 = vmatpush1.bf16.msra.mxu1 %v2993_v29  ;;  %v3080_v28 = vld [vmem:[%s3305_s3 + $0x58] sm:$0xff]  }
  0xe1   :  { %1740 = vmatprep.subr.bf16.mxu0 %v2998_v30  ;;  %1904 = vmatprep.subr.bf16.mxu1 %v3001_v31  ;;  %v3081_v29 = vld [vmem:[%s3305_s3 + $0xd8] sm:$0xff]  }
  0xe2   :  { %v3082_v30 = vld [vmem:[%s3305_s3 + $0x18] sm:$0xff]  }
  0xe3   :  { %v3083_v31 = vld [vmem:[%s3305_s3 + $0x98] sm:$0xff]  }
  0xe4   :  { %1741 = vmatpush1.bf16.msra.mxu0 %v2996_v32  ;;  %1905 = vmatpush1.bf16.msra.mxu1 %v2999_v33  ;;  %v3084_v32 = vld [vmem:[%s3305_s3 + $0x60] sm:$0xff]  }
  0xe5   :  { %1742 = vmatprep.subr.bf16.mxu0 %v3004_v34  ;;  %1906 = vmatprep.subr.bf16.mxu1 %v3007_v35  ;;  %v3085_v33 = vld [vmem:[%s3305_s3 + $0xe0] sm:$0xff]  }
  0xe6   :  { %v3086_v34 = vld [vmem:[%s3305_s3 + $0x20] sm:$0xff]  }
  0xe7   :  { %v3087_v35 = vld [vmem:[%s3305_s3 + $0xa0] sm:$0xff]  }
  0xe8   :  { %1743 = vmatpush1.bf16.msra.mxu0 %v3002_v36  ;;  %1907 = vmatpush1.bf16.msra.mxu1 %v3005_v37  ;;  %v3088_v36 = vld [vmem:[%s3305_s3 + $0x68] sm:$0xff]  }
  0xe9   :  { %1744 = vmatprep.subr.bf16.mxu0 %v3010_v38  ;;  %1908 = vmatprep.subr.bf16.mxu1 %v3013_v39  ;;  %v3089_v37 = vld [vmem:[%s3305_s3 + $0xe8] sm:$0xff]  }
  0xea   :  { %v3090_v38 = vld [vmem:[%s3305_s3 + $0x28] sm:$0xff]  }
  0xeb   :  { %v3091_v39 = vld [vmem:[%s3305_s3 + $0xa8] sm:$0xff]  }
  0xec   :  { %1745 = vmatpush1.bf16.msra.mxu0 %v3008_v40  ;;  %1909 = vmatpush1.bf16.msra.mxu1 %v3011_v41  ;;  %v3092_v40 = vld [vmem:[%s3305_s3 + $0x70] sm:$0xff]  }
  0xed   :  { %1746 = vmatprep.subr.bf16.mxu0 %v3016_v42  ;;  %1910 = vmatprep.subr.bf16.mxu1 %v3019_v43  ;;  %v3093_v41 = vld [vmem:[%s3305_s3 + $0xf0] sm:$0xff]  }
  0xee   :  { %v3094_v42 = vld [vmem:[%s3305_s3 + $0x30] sm:$0xff]  }
  0xef   :  { %v3095_v43 = vld [vmem:[%s3305_s3 + $0xb0] sm:$0xff]  }
  0xf0   :  { %1747 = vmatpush1.bf16.msra.mxu0 %v3014_v44  ;;  %1911 = vmatpush1.bf16.msra.mxu1 %v3017_v45  ;;  %v3096_v44 = vld [vmem:[%s3305_s3 + $0x78] sm:$0xff]  }
  0xf1   :  { %1748 = vmatprep.subr.bf16.mxu0 %v3022_v46  ;;  %1912 = vmatprep.subr.bf16.mxu1 %v3025_v47  ;;  %v3097_v45 = vld [vmem:[%s3305_s3 + $0xf8] sm:$0xff]  }
  0xf2   :  { %v3098_v46 = vld [vmem:[%s3305_s3 + $0x38] sm:$0xff]  }
  0xf3   :  { %v3099_v47 = vld [vmem:[%s3305_s3 + $0xb8] sm:$0xff]  }
  0xf4   :  { %1749 = vmatpush1.bf16.msra.mxu0 %v3020_v48  ;;  %1913 = vmatpush1.bf16.msra.mxu1 %v3023_v49  ;;  %v309_v48 = vlaneseq }
  0xf5   :  { %1750 = vmatprep.subr.bf16.mxu0 %v3028_v50  ;;  %1914 = vmatprep.subr.bf16.mxu1 %v3031_v51 }
  0xf6   :  { %v310_v49 = vshrl.u32 %v309_v48, 7 }
  0xf8   :  { %1751 = vmatpush1.bf16.msra.mxu0 %v3026_v52  ;;  %1915 = vmatpush1.bf16.msra.mxu1 %v3029_v53  ;;  %v311_v50 = vsub.s32 0, %v310_v49  ;;  %v319_v51 = vsub.s32 2, %v310_v49  ;;  %v307_v52 = vld [vmem:[%s3304_s2] sm:$0xf]  ;;  %v315_v53 = vsub.s32 1, %v310_v49 }
  0xf9   :  { %1752 = vmatprep.subr.bf16.mxu0 %v3034_v54  ;;  %1916 = vmatprep.subr.bf16.mxu1 %v3037_v55  ;;  %v323_v54 = vsub.s32 3, %v310_v49 }
  0xfa   :  { %v312_v55 = vrot.slane %v307_v52, %v311_v50 }
  0xfc   :  { %1753 = vmatpush1.bf16.msra.mxu0 %v3032_v56  ;;  %1917 = vmatpush1.bf16.msra.mxu1 %v3035_v57  ;;  %v320_v56 = vrot.slane %v307_v52, %v319_v51  ;;  %v316_v57 = vrot.slane %v307_v52, %v315_v53 }
  0xfd   :  { %1754 = vmatprep.subr.bf16.mxu0 %v3040_v58  ;;  %1918 = vmatprep.subr.bf16.mxu1 %v3043_v59  ;;  %v324_v58 = vrot.slane %v307_v52, %v323_v54 }
 0x100   :  { %1755 = vmatpush1.bf16.msra.mxu0 %v3038_v60  ;;  %1919 = vmatpush1.bf16.msra.mxu1 %v3041_v61 }
 0x101   :  { %1756 = vmatprep.subr.bf16.mxu0 %v3046_v62  ;;  %1920 = vmatprep.subr.bf16.mxu1 %v3049_v63 }
 0x104   :  { %1757 = vmatpush1.bf16.msra.mxu0 %v3044_v0  ;;  %1921 = vmatpush1.bf16.msra.mxu1 %v3047_v1 }
 0x105   :  { %1758 = vmatprep.subr.bf16.mxu0 %v3052_v2  ;;  %1922 = vmatprep.subr.bf16.mxu1 %v3055_v3 }
 0x108   :  { %1759 = vmatpush1.bf16.msra.mxu0 %v3050_v4  ;;  %1923 = vmatpush1.bf16.msra.mxu1 %v3053_v5 }
 0x109   :  { %1760 = vmatprep.subr.bf16.mxu0 %v3058_v6  ;;  %1924 = vmatprep.subr.bf16.mxu1 %v3061_v7 }
 0x10c   :  { %1761 = vmatpush1.bf16.msra.mxu0 %v3056_v8  ;;  %1925 = vmatpush1.bf16.msra.mxu1 %v3059_v9 }
 0x10d   :  { %1762 = vmatprep.subr.bf16.mxu0 %v3064_v10  ;;  %1926 = vmatprep.subr.bf16.mxu1 %v3067_v11 }
 0x110   :  { %1763 = vmatpush1.bf16.msra.mxu0 %v3062_v12  ;;  %1927 = vmatpush1.bf16.msra.mxu1 %v3065_v13 }
 0x111   :  { %2609 = vmatprep.subr.bf16.mxu0 %v3068_v15  ;;  %2631 = vmatprep.subr.bf16.mxu1 %v3069_v16 }
 0x113   :  { %1765 = vmatmul.mubr.bf16.vlgmr.msra.gmra.mrb[0].mxu0 %v49_v17  ;;  %1929 = vmatmul.mubr.bf16.vlgmr.msra.gmra.mrb[0].mxu1 %v49_v17 }
 0x114   :  { %2610 = vmatpush3.bf16.msra.mxu0 %v3070_v18  ;;  %2632 = vmatpush3.bf16.msra.mxu1 %v3071_v19 }
 0x115   :  { %2611 = vmatprep.subr.bf16.mxu0 %v3072_v20  ;;  %2633 = vmatprep.subr.bf16.mxu1 %v3073_v21  ;;  %v2576_v21 = vld [vmem:[%s3306_s4] ss:$0 sm:$0xff] }
 0x118   :  { %2612 = vmatpush3.bf16.msra.mxu0 %v3074_v22  ;;  %2634 = vmatpush3.bf16.msra.mxu1 %v3075_v23 }
 0x119   :  { %2613 = vmatprep.subr.bf16.mxu0 %v3076_v24  ;;  %2635 = vmatprep.subr.bf16.mxu1 %v3077_v25 }
 0x11c   :  { %2614 = vmatpush3.bf16.msra.mxu0 %v3078_v26  ;;  %2636 = vmatpush3.bf16.msra.mxu1 %v3079_v27 }
 0x11d   :  { %2615 = vmatprep.subr.bf16.mxu0 %v3080_v28  ;;  %2637 = vmatprep.subr.bf16.mxu1 %v3081_v29 }
 0x120   :  { %2616 = vmatpush3.bf16.msra.mxu0 %v3082_v30  ;;  %2638 = vmatpush3.bf16.msra.mxu1 %v3083_v31 }
 0x121   :  { %2617 = vmatprep.subr.bf16.mxu0 %v3084_v32  ;;  %2639 = vmatprep.subr.bf16.mxu1 %v3085_v33 }
 0x124   :  { %2618 = vmatpush3.bf16.msra.mxu0 %v3086_v34  ;;  %2640 = vmatpush3.bf16.msra.mxu1 %v3087_v35 }
 0x125   :  { %2619 = vmatprep.subr.bf16.mxu0 %v3088_v36  ;;  %2641 = vmatprep.subr.bf16.mxu1 %v3089_v37 }
 0x128   :  { %2620 = vmatpush3.bf16.msra.mxu0 %v3090_v38  ;;  %2642 = vmatpush3.bf16.msra.mxu1 %v3091_v39 }
 0x129   :  { %2621 = vmatprep.subr.bf16.mxu0 %v3092_v40  ;;  %2643 = vmatprep.subr.bf16.mxu1 %v3093_v41 }
 0x12c   :  { %2622 = vmatpush3.bf16.msra.mxu0 %v3094_v42  ;;  %2644 = vmatpush3.bf16.msra.mxu1 %v3095_v43 }
 0x12d   :  { %2623 = vmatprep.subr.bf16.mxu0 %v3096_v44  ;;  %2645 = vmatprep.subr.bf16.mxu1 %v3097_v45  ;;  %v2309_v45 = vand.u32 127, %v309_v48 }
 0x12f   :  { %vm2310_vm0 = vcmp.lt.s32.totalorder %v2309_v45, 4 }
 0x130   :  { %2624 = vmatpush3.bf16.msra.mxu0 %v3098_v46  ;;  %2646 = vmatpush3.bf16.msra.mxu1 %v3099_v47 }
 0x1e6   :  { %v1766_v59 = vpop.f32.mrb[0].mxu0  ;;  %v1930_v60 = vpop.f32.mrb[0].mxu1 }
 0x1e7   :  { %v2653_v61 = vadd.f32 %v1766_v59, %v312_v55  ;;  %v2655_v62 = vadd.f32 %v1930_v60, %v320_v56  ;;  %v1768_v63 = vpop.f32.mrb[1].mxu0  ;;  %v1932_v0 = vpop.f32.mrb[1].mxu1 }
 0x1e8   :  { %v2654_v1 = vadd.f32 %v1768_v63, %v316_v57  ;;  %v2656_v2 = vadd.f32 %v1932_v0, %v324_v58  ;;  %v1770_v3 = vpop.f32.mrb[2].mxu0  ;;  %v1934_v4 = vpop.f32.mrb[2].mxu1 }
 0x1e9   :  { %v1937_v5 = vmul.f32 0.2, %v2653_v61  ;;  %v1939_v6 = vmul.f32 0.2, %v2655_v62  ;;  %v1771_v7 = vpop.f32.mrb[3].mxu0  ;;  %v1935_v8 = vpop.f32.mrb[3].mxu1 }
 0x1ea   :  { %v1938_v9 = vmul.f32 0.2, %v2654_v1  ;;  %v1940_v10 = vmul.f32 0.2, %v2656_v2 }
 0x1eb   :  { %v1941_v11 = vmax.f32 %v2653_v61, %v1937_v5  ;;  %v1943_v12 = vmax.f32 %v2655_v62, %v1939_v6 }
 0x1ec   :  { %v1942_v13 = vmax.f32 %v2654_v1, %v1938_v9  ;;  %v1944_v14 = vmax.f32 %v2656_v2, %v1940_v10 }
 0x1ed   :  { %v1945_v17 = vpack.c.bf16 %v1941_v11, %v1941_v11  ;;  %v1947_v18 = vpack.c.bf16 %v1943_v12, %v1943_v12 }
 0x1ee   :  { %v1946_v15 = vpack.c.bf16 %v1942_v13, %v1942_v13  ;;  %v1948_v16 = vpack.c.bf16 %v1944_v14, %v1944_v14 }
 0x1f0   :  { %2244 = vmatprep.mubr.bf16.mxu0 %v1946_v15  ;;  %2284 = vmatprep.mubr.bf16.mxu1 %v1948_v16 }
 0x1f1   :  { %2245 = vmatmul.mubr.bf16.vlgmr.msra.gmra.mrb[4].mxu0 %v1945_v17  ;;  %2285 = vmatmul.mubr.bf16.vlgmr.msra.gmra.mrb[4].mxu1 %v1947_v18 }
 0x2c4   :  { %v2625_v19 = vpop.f32.mrb[4].mxu0  ;;  %v2647_v20 = vpop.f32.mrb[4].mxu1 }
 0x2c5   :  { %v2626_v22 = vpop.f32.mrb[5].mxu0  ;;  %v2648_v23 = vpop.f32.mrb[5].mxu1 }
 0x2c6   :  { %v2627_v24 = vadd.f32 %v2626_v22, %v2625_v19  ;;  %v2649_v25 = vadd.f32 %v2648_v23, %v2647_v20  ;;  %v2628_v26 = vpop.f32.mrb[6].mxu0  ;;  %v2650_v27 = vpop.f32.mrb[6].mxu1 }
 0x2c7   :  { %v2629_v28 = vpop.f32.mrb[7].mxu0  ;;  %v2651_v29 = vpop.f32.mrb[7].mxu1 }
 0x2c8   :  { %v2247_v30 = vadd.f32 %v2627_v24, %v2576_v21 }
 0x2ca   :  { %v2287_v31 = vadd.f32 %v2649_v25, %v2247_v30 }
 0x2cc   :  { %v2292_v32 = vrot.slane %v2287_v31, 4 }
 0x2ce   :  { %v2293_v33 = vadd.f32 %v2292_v32, %v2287_v31 }
 0x2d0   :  { %v2294_v34 = vrot.slane %v2293_v33, 2 }
 0x2d2   :  { %v2295_v35 = vadd.f32 %v2294_v34, %v2293_v33 }
 0x2d4   :  { %v2296_v36 = vrot.slane %v2295_v35, 1 }
 0x2d6   :  { %v2297_v37 = vadd.f32 %v2296_v36, %v2295_v35 }
 0x2d8   :  { %v2298_v38 = vmul.f32 0.125, %v2297_v37 }
 0x2da   :  { %v2299_v39 = vsub.f32 %v2287_v31, %v2298_v38 }
 0x2dc   :  { %v2300_v40 = vmul.f32 %v2299_v39, %v2299_v39 }
 0x2de   :  { %v2301_v41 = vrot.slane %v2300_v40, 4 }
 0x2e0   :  { %v2302_v42 = vadd.f32 %v2301_v41, %v2300_v40 }
 0x2e2   :  { %v2303_v43 = vrot.slane %v2302_v42, 2 }
 0x2e4   :  { %v2304_v44 = vadd.f32 %v2303_v43, %v2302_v42 }
 0x2e6   :  { %v2305_v46 = vrot.slane %v2304_v44, 1 }
 0x2e8   :  { %v2306_v47 = vadd.f32 %v2305_v46, %v2304_v44 }
 0x2ea   :  { %v2307_v49 = vmul.f32 0.125, %v2306_v47 }
 0x2ec   :  { %v2311_v50 = vsel %vm2310_vm0, %v2307_v49, 1.0 }
 0x2ed   :  { %3100 = vrsqrt.f32 %v2311_v50 }
 0x2f7   :  { %v3101_v51 = vpop.eup %3100 }
 0x2f8   :  { %v2313_v52 = vmul.f32 %v3101_v51, %v2299_v39 }
 0x2fa   :  { %2314 = vst [vmem:[%s3307_s5] sm:$0xff] %v2313_v52 }
 0x2fb   :  { %2319 = vsyncpa [#allocation3], 1 }

</bundles_post_ra>
